<compile_context>
chip_gen: v6e
topology: v6e:2x2x1
jax: 0.10.0
libtpu: 0.0.40
codegen_flags: <defaults>
</compile_context>

<pallas_src>
import functools

import jax
import jax.numpy as jnp
from jax.experimental import pallas as pl
from jax.experimental.pallas import tpu as pltpu


def _round_up(a, b):
    return (a + b - 1) // b * b


def _ceil_div(a, b):
    return -(-a // b)


# ---------------------------------------------------------------------------
# Pallas kernel: one (i, j, k) grid step of  Y = X @ T  with f32 accumulation.
# ---------------------------------------------------------------------------
def _spectral_matmul_kernel(x_ref, t_ref, y_ref, acc_ref):
    @pl.when(pl.program_id(2) == 0)
    def _init():
        acc_ref[...] = jnp.zeros_like(acc_ref)

    acc_ref[...] += jnp.dot(
        x_ref[...], t_ref[...], preferred_element_type=jnp.float32
    )

    @pl.when(pl.program_id(2) == pl.num_programs(2) - 1)
    def _finalize():
        y_ref[...] = acc_ref[...].astype(y_ref.dtype)


# ---------------------------------------------------------------------------
# Per-generation hardware plan (VMEM budget, lane alignment).
# ---------------------------------------------------------------------------
def _hardware_plan():
    """Returns (vmem_limit_bytes, planning_budget_bytes, lane_align)."""
    cap = None
    try:
        cap = int(pltpu.get_tpu_info().vmem_capacity_bytes)
    except Exception:
        cap = None
    kind = ""
    try:
        kind = jax.devices()[0].device_kind.lower()
    except Exception:
        pass
    if cap is None or cap <= 0:
        # v5e/v5p/v6e have 128 MiB VMEM per TensorCore; v7x has 64 MiB.
        cap = 128 * 1024 * 1024 if ("v5" in kind or "v6" in kind) else 64 * 1024 * 1024
    # Headroom for Mosaic-internal scratch: ~112 MiB on 128-MiB parts,
    # ~56 MiB on 64-MiB parts (v7x).
    vmem_limit = cap - max(cap // 8, 8 * 1024 * 1024)
    # Plan tiles against a budget below the requested limit so approximate
    # accounting never makes the kernel fail to compile.
    budget = vmem_limit - 8 * 1024 * 1024
    # v6e/v7x MXUs are 256x256; v5e/v5p are 128x128 (128-alignment suffices).
    lane_align = 128 if "v5" in kind else 256
    return int(vmem_limit), int(budget), lane_align


def _plan_tiles(M, EN, ON, xbytes, budget, lane_align):
    """Choose (TM, TK, TN) and padded extents; all values are Python ints."""
    tk_cap, tn_cap, tm_cap = 2048, 512, 1024  # caps are multiples of 128 & 256

    # Pick the number of tiles first, then the lane-aligned tile size, so the
    # zero padding stays small even when the cap does not divide the extent.
    EN_a = _round_up(EN, lane_align)
    ON_a = _round_up(ON, lane_align)
    nk = max(1, _ceil_div(EN_a, tk_cap))
    TK = _round_up(_ceil_div(EN_a, nk), lane_align)
    EN_pad = TK * nk
    nj = max(1, _ceil_div(ON_a, tn_cap))
    TN = _round_up(_ceil_div(ON_a, nj), lane_align)
    ON_pad = TN * nj

    # T needs no double buffer when it is a single, never-changing block.
    t_bufs = 1 if (nk == 1 and nj == 1) else 2
    t_block_bytes = TK * TN * xbytes * t_bufs
    per_row_bytes = (2 * TK * xbytes   # x tile, double-buffered
                     + 2 * TN * 4      # f32 output tile, double-buffered
                     + TN * 4)         # f32 accumulator scratch
    avail = max(budget - t_block_bytes, per_row_bytes * 8)

    TM = max(8, min(tm_cap, avail // per_row_bytes))
    TM = min(TM, _round_up(M, 8))
    if TM >= 256:
        TM = TM // 256 * 256          # full MXU-width row tiles when possible
    elif TM >= 128:
        TM = TM // 128 * 128
    else:
        TM = max(8, TM // 8 * 8)

    # Keep >= 2 parallel grid steps when M allows, so dual-TensorCore chips
    # (v7x) do not idle one core.
    if nj == 1 and _round_up(M, TM) // TM < 2 and M > 8:
        TM = min(TM, max(8, _round_up(_ceil_div(M, 2), 8)))

    M_pad = _round_up(M, TM)
    return TM, TK, TN, M_pad, EN_pad, ON_pad, t_bufs


# ---------------------------------------------------------------------------
# Operator construction (pure JAX glue).  Hoist this for static weights.
# ---------------------------------------------------------------------------
def build_spectral_operator(weights_real, weights_imag, seq_len, modes):
    """Fuse truncated-rfft -> complex channel mix -> irfft into one dense real
    operator T of shape (E*N, O*N), so the forward is  y = x @ T  with rows
    flattened as (e, n) and columns as (o, n').  Exact, not approximate."""
    E, O, K = weights_real.shape
    N = int(seq_len)
    assert K == int(modes)
    assert K <= N // 2 + 1, "modes must be <= seq_len // 2 + 1"
    # Guard the int32 modular product used for the angle tables (K <= 32 in
    # this module, so this never triggers in practice).
    assert (K - 1) * (N - 1) < 2 ** 31, "angle table would overflow int32"

    n = jnp.arange(N, dtype=jnp.int32)
    k = jnp.arange(K, dtype=jnp.int32)
    # Exact integer (n*k) % N before float conversion keeps the DFT angles
    # accurate for large N.
    nk_mod = (n[:, None] * k[None, :]) % N
    ang = (2.0 * jnp.pi / N) * nk_mod.astype(jnp.float32)
    C = jnp.cos(ang)            # (N, K)  rfft real basis
    S = -jnp.sin(ang)           # (N, K)  rfft imag basis

    # irfft with only bins 0..K-1 non-zero:
    #   y[n'] = (1/N) sum_k w_k (Re X_k cos(2*pi*k*n'/N) - Im X_k sin(...))
    # w = 1 for the DC and (if present) Nyquist bins, 2 otherwise; sin()=0 at
    # those bins, so their imaginary parts are ignored exactly like
    # torch.fft.irfft does.
    w = jnp.where((k == 0) | (2 * k == N), 1.0, 2.0).astype(jnp.float32)
    ICr = (w[None, :] * C).T / N     # (K, N) =  w_k cos(2*pi*k*n'/N) / N
    ICi = (w[None, :] * S).T / N     # (K, N) = -w_k sin(2*pi*k*n'/N) / N

    Wr = weights_real.astype(jnp.float32)
    Wi = weights_imag.astype(jnp.float32)

    # out_r[.,o,k] = sum_{e,n} x[.,e,n] (C[n,k] Wr[e,o,k] - S[n,k] Wi[e,o,k])
    # out_i[.,o,k] = sum_{e,n} x[.,e,n] (C[n,k] Wi[e,o,k] + S[n,k] Wr[e,o,k])
    Ar = jnp.einsum('nk,eok->enok', C, Wr) - jnp.einsum('nk,eok->enok', S, Wi)
    Ai = jnp.einsum('nk,eok->enok', C, Wi) + jnp.einsum('nk,eok->enok', S, Wr)
    T = (jnp.einsum('enok,km->enom', Ar, ICr)
         + jnp.einsum('enok,km->enom', Ai, ICi))           # (E, N, O, N)
    return T.reshape(E * N, O * N)


# ---------------------------------------------------------------------------
# Pallas-backed application of the fused operator.
# ---------------------------------------------------------------------------
def spectral_conv1d_apply(x, T, *, out_channels, compute_dtype=jnp.bfloat16):
    """x: (B, H, E, N) float; T: (E*N, O*N) from build_spectral_operator."""
    B, H, E, N = x.shape
    O = int(out_channels)
    M, EN, ON = B * H, E * N, O * N
    assert T.shape == (EN, ON)

    cdt = jnp.dtype(compute_dtype)
    xbytes = cdt.itemsize
    vmem_limit, budget, lane_align = _hardware_plan()
    TM, TK, TN, M_pad, EN_pad, ON_pad, t_bufs = _plan_tiles(
        M, EN, ON, xbytes, budget, lane_align)

    # Zero-pad the operator (zero rows/columns are exact).
    T_c = T.astype(cdt)
    if (EN_pad, ON_pad) != (EN, ON):
        T_c = jnp.zeros((EN_pad, ON_pad), cdt).at[:EN, :ON].set(T_c)

    # Single combined cast + (row, lane) pad of the activation.
    xf = x.reshape(M, EN)
    if (M_pad, EN_pad) != (M, EN):
        x_c = jnp.zeros((M_pad, EN_pad), cdt).at[:M, :EN].set(xf.astype(cdt))
    else:
        x_c = xf.astype(cdt)

    ni, nj, nk = M_pad // TM, ON_pad // TN, EN_pad // TK

    t_spec_kwargs = {}
    if t_bufs == 1:
        # T is a single block whose index never changes: one buffer suffices.
        t_spec_kwargs["pipeline_mode"] = pl.Buffered(1)

    cost = pl.CostEstimate(
        flops=2 * M_pad * EN_pad * ON_pad,
        bytes_accessed=(nj * M_pad * EN_pad * xbytes
                        + ni * EN_pad * ON_pad * xbytes
                        + M_pad * ON_pad * 4),
        transcendentals=0,
    )

    y_pad = pl.pallas_call(
        _spectral_matmul_kernel,
        out_shape=jax.ShapeDtypeStruct((M_pad, ON_pad), jnp.float32),
        grid_spec=pltpu.PrefetchScalarGridSpec(
            num_scalar_prefetch=0,
            grid=(ni, nj, nk),
            in_specs=[
                pl.BlockSpec((TM, TK), lambda i, j, k: (i, k)),
                pl.BlockSpec((TK, TN), lambda i, j, k: (k, j), **t_spec_kwargs),
            ],
            out_specs=pl.BlockSpec((TM, TN), lambda i, j, k: (i, j)),
            scratch_shapes=[pltpu.VMEM((TM, TN), jnp.float32)],
        ),
        compiler_params=pltpu.CompilerParams(
            dimension_semantics=("parallel", "parallel", "arbitrary"),
            vmem_limit_bytes=vmem_limit),
        cost_estimate=cost,
    )(x_c, T_c)

    return y_pad[:M, :ON].reshape(B, H, O, N)


@functools.partial(
    jax.jit, static_argnames=("out_channels", "modes", "compute_dtype"))
def spectral_conv1d(x, weights_real, weights_imag, *, out_channels, modes,
                    compute_dtype=jnp.bfloat16):
    """Full SpectralConv1d forward.  For inference with static weights, call
    build_spectral_operator() once outside the step function and reuse it
    with spectral_conv1d_apply()."""
    N = x.shape[-1]
    T = build_spectral_operator(weights_real, weights_imag, N, modes)
    return spectral_conv1d_apply(x, T, out_channels=out_channels,
                                 compute_dtype=compute_dtype)


# ---------------------------------------------------------------------------
# Pure-JAX reference mirroring the PyTorch forward.
# ---------------------------------------------------------------------------
def reference_spectral_conv1d(x, Wr, Wi, out_channels, modes):
    B, H, E, N = x.shape
    x_ft = jnp.fft.rfft(x, axis=-1)
    a = x_ft[..., :modes]
    out_real = (jnp.einsum('bjix,iox->bjox', a.real, Wr)
                - jnp.einsum('bjix,iox->bjox', a.imag, Wi))
    out_imag = (jnp.einsum('bjix,iox->bjox', a.real, Wi)
                + jnp.einsum('bjix,iox->bjox', a.imag, Wr))
    out_ft = jnp.zeros((B, H, out_channels, N // 2 + 1), dtype=jnp.complex64)
    out_ft = out_ft.at[..., :modes].set(out_real + 1j * out_imag)
    return jnp.fft.irfft(out_ft, n=N, axis=-1)


if __name__ == "__main__":
    # Small shapes consistent with the module: batch=2, "heads"=4,
    # in_channels=4, seq_len=16  ->  modes = min(32, 16 // 2) = 8.
    B, H, E, N = 2, 4, 4, 16
    out_channels = 4
    modes = min(32, N // 2)
    scale = 1.0 / (E * out_channels)

    key = jax.random.PRNGKey(0)
    kx, kr, ki = jax.random.split(key, 3)
    x = jax.random.normal(kx, (B, H, E, N), dtype=jnp.float32)
    weights_real = scale * jax.random.uniform(
        kr, (E, out_channels, modes), dtype=jnp.float32)
    weights_imag = scale * jax.random.uniform(
        ki, (E, out_channels, modes), dtype=jnp.float32)

    y_ref = reference_spectral_conv1d(x, weights_real, weights_imag,
                                      out_channels, modes)

    # f32 path: bit-tight agreement with the pure-JAX reference.
    y_f32 = spectral_conv1d(x, weights_real, weights_imag,
                            out_channels=out_channels, modes=modes,
                            compute_dtype=jnp.float32)
    y_f32 = jax.block_until_ready(y_f32)
    assert y_f32.shape == (B, H, out_channels, N)
    assert jnp.allclose(y_f32, y_ref, atol=1e-4, rtol=1e-4), (
        "f32 max abs err = %f" % float(jnp.max(jnp.abs(y_f32 - y_ref))))

    # bf16 path (default, MXU-native with f32 accumulation): looser tolerance.
    y_bf16 = spectral_conv1d(x, weights_real, weights_imag,
                             out_channels=out_channels, modes=modes)
    y_bf16 = jax.block_until_ready(y_bf16)
    assert y_bf16.shape == (B, H, out_channels, N)
    assert jnp.allclose(y_bf16, y_ref, atol=5e-2, rtol=5e-2), (
        "bf16 max abs err = %f" % float(jnp.max(jnp.abs(y_bf16 - y_ref))))

    print("KERNEL_OK")
</pallas_src>

<mosaic_0001>
module attributes {stable_mosaic.version = 11 : i64} {
  func.func @_spectral_matmul_kernel(%arg0: i32, %arg1: i32, %arg2: i32, %arg3: memref<8x256xf32, #tpu.memory_space<vmem>>, %arg4: memref<256x256xf32, #tpu.memory_space<vmem>>, %arg5: memref<8x256xf32, #tpu.memory_space<vmem>>, %arg6: memref<8x256xf32, #tpu.memory_space<vmem>>) attributes {dimension_semantics = [#tpu.dimension_semantics<parallel>, #tpu.dimension_semantics<parallel>, #tpu.dimension_semantics<arbitrary>], iteration_bounds = array<i64: 1, 1, 1>, scalar_prefetch = 0 : i64, scratch_operands = 1 : i64, tpu.core_type = #tpu.core_type<tc>, window_params = [{transform_indices = @transform_0, window_bounds = array<i64: 8, 256>}, {pipeline_mode = #tpu.pipeline_mode<synchronous>, transform_indices = @transform_1, window_bounds = array<i64: 256, 256>}, {transform_indices = @transform_2, window_bounds = array<i64: 8, 256>}]} {
    %c0_i32 = arith.constant 0 : i32
    %0 = arith.cmpi eq, %arg2, %c0_i32 : i32
    %1 = arith.extui %0 : i1 to i32
    %c0_i32_0 = arith.constant 0 : i32
    %2 = arith.cmpi ne, %1, %c0_i32_0 : i32
    scf.if %2 {
      %cst_10 = arith.constant 0.000000e+00 : f32
      %12 = vector.broadcast %cst_10 : f32 to vector<8x256xf32>
      %c0_11 = arith.constant 0 : index
      %c0_12 = arith.constant 0 : index
      %13 = vector.load %arg6[%c0_11, %c0_12] : memref<8x256xf32, #tpu.memory_space<vmem>>, vector<8x256xf32>
      tpu.vector_store %arg6[%c0_11, %c0_12], %12 {strides = array<i32>} : memref<8x256xf32, #tpu.memory_space<vmem>>, vector<8x256xf32>,
    } else {
    }
    %c0 = arith.constant 0 : index
    %c0_1 = arith.constant 0 : index
    %3 = vector.load %arg6[%c0, %c0_1] : memref<8x256xf32, #tpu.memory_space<vmem>>, vector<8x256xf32>
    %c0_2 = arith.constant 0 : index
    %c0_3 = arith.constant 0 : index
    %4 = vector.load %arg3[%c0_2, %c0_3] : memref<8x256xf32, #tpu.memory_space<vmem>>, vector<8x256xf32>
    %c0_4 = arith.constant 0 : index
    %c0_5 = arith.constant 0 : index
    %5 = vector.load %arg4[%c0_4, %c0_5] : memref<256x256xf32, #tpu.memory_space<vmem>>, vector<256x256xf32>
    %cst = arith.constant dense<0.000000e+00> : vector<8x256xf32>
    %6 = tpu.matmul %4, %5, %cst {dimension_numbers = #tpu.dot_dimension_numbers<[1], [0], [0], [1], [0, 0, 1, 1], [], []>} : vector<8x256xf32>, vector<256x256xf32>, vector<8x256xf32> -> vector<8x256xf32>
    %7 = arith.addf %3, %6 : vector<8x256xf32>
    %c0_6 = arith.constant 0 : index
    %c0_7 = arith.constant 0 : index
    %8 = vector.load %arg6[%c0_6, %c0_7] : memref<8x256xf32, #tpu.memory_space<vmem>>, vector<8x256xf32>
    tpu.vector_store %arg6[%c0_6, %c0_7], %7 {strides = array<i32>} : memref<8x256xf32, #tpu.memory_space<vmem>>, vector<8x256xf32>,
    %c0_i32_8 = arith.constant 0 : i32
    %9 = arith.cmpi eq, %arg2, %c0_i32_8 : i32
    %10 = arith.extui %9 : i1 to i32
    %c0_i32_9 = arith.constant 0 : i32
    %11 = arith.cmpi ne, %10, %c0_i32_9 : i32
    scf.if %11 {
      %c0_10 = arith.constant 0 : index
      %c0_11 = arith.constant 0 : index
      %12 = vector.load %arg6[%c0_10, %c0_11] : memref<8x256xf32, #tpu.memory_space<vmem>>, vector<8x256xf32>
      %c0_12 = arith.constant 0 : index
      %c0_13 = arith.constant 0 : index
      %13 = vector.load %arg5[%c0_12, %c0_13] : memref<8x256xf32, #tpu.memory_space<vmem>>, vector<8x256xf32>
      tpu.vector_store %arg5[%c0_12, %c0_13], %12 {strides = array<i32>} : memref<8x256xf32, #tpu.memory_space<vmem>>, vector<8x256xf32>,
    } else {
    }
    return
  }
  func.func @transform_0(%arg0: i32, %arg1: i32, %arg2: i32) -> (i32, i32) {
    %c0_i32 = arith.constant 0 : i32
    return %arg0, %arg2 : i32, i32
  }
  func.func @transform_1(%arg0: i32, %arg1: i32, %arg2: i32) -> (i32, i32) {
    %c0_i32 = arith.constant 0 : i32
    return %arg2, %arg1 : i32, i32
  }
  func.func @transform_2(%arg0: i32, %arg1: i32, %arg2: i32) -> (i32, i32) {
    %c0_i32 = arith.constant 0 : i32
    return %arg0, %arg1 : i32, i32
  }
}

</mosaic_0001>

<bundles_post_ra>
// kernel: spectral_conv1d.1
= control target key start
LH: loop header
LB: loop body
LE: loop exit
PB: predicated region body
PF: predicated region fallthrough
CT: control target
= control target key end

     0   :  { %s390_s1 = inlined_call_operand.vmem [shape: f32[256,256], index: 1, kind: input, shape index: {}]   ;;  %s391_s0 = inlined_call_operand.vmem [shape: f32[8,256], index: 0, kind: input, shape index: {}]   ;;  %s392_s2 = inlined_call_operand.vmem [shape: f32[8,256], index: 2, kind: output, shape index: {}]  }
   0x1   :  { %v52_v0 = vld [vmem:[%s390_s1 + $0xf8] sm:$0xff]  ;;  %v51_v1 = vld [vmem:[%s390_s1 + $0xf0] sm:$0xff]  ;;  %v50_v2 = vld [vmem:[%s390_s1 + $0xe8] sm:$0xff] }
   0x2   :  { %85 = vmatprep.subr.mxu0 %v52_v0  ;;  %v49_v3 = vld [vmem:[%s390_s1 + $0xe0] sm:$0xff]  ;;  %v48_v4 = vld [vmem:[%s390_s1 + $0xd8] sm:$0xff]  ;;  %v47_v5 = vld [vmem:[%s390_s1 + $0xd0] sm:$0xff] }
   0x3   :  { %86 = vmatpush1.msra.mxu0 %v51_v1  ;;  %v46_v6 = vld [vmem:[%s390_s1 + $0xc8] sm:$0xff]  ;;  %v45_v7 = vld [vmem:[%s390_s1 + $0xc0] sm:$0xff]  ;;  %v44_v8 = vld [vmem:[%s390_s1 + $0xb8] sm:$0xff] }
   0x4   :  { %87 = vmatprep.subr.mxu0 %v50_v2  ;;  %v43_v9 = vld [vmem:[%s390_s1 + $0xb0] sm:$0xff]  ;;  %v42_v10 = vld [vmem:[%s390_s1 + $0xa8] sm:$0xff]  ;;  %v41_v11 = vld [vmem:[%s390_s1 + $0xa0] sm:$0xff] }
   0x5   :  { %88 = vmatpush1.msra.mxu0 %v49_v3  ;;  %v40_v12 = vld [vmem:[%s390_s1 + $0x98] sm:$0xff]  ;;  %v39_v13 = vld [vmem:[%s390_s1 + $0x90] sm:$0xff]  ;;  %v38_v14 = vld [vmem:[%s390_s1 + $0x88] sm:$0xff] }
   0x6   :  { %89 = vmatprep.subr.mxu0 %v48_v4  ;;  %v37_v15 = vld [vmem:[%s390_s1 + $0x80] sm:$0xff]  ;;  %v36_v16 = vld [vmem:[%s390_s1 + $0x78] sm:$0xff]  ;;  %v35_v17 = vld [vmem:[%s390_s1 + $0x70] sm:$0xff] }
   0x7   :  { %90 = vmatpush1.msra.mxu0 %v47_v5  ;;  %v34_v18 = vld [vmem:[%s390_s1 + $0x68] sm:$0xff]  ;;  %v33_v19 = vld [vmem:[%s390_s1 + $0x60] sm:$0xff]  ;;  %v32_v20 = vld [vmem:[%s390_s1 + $0x58] sm:$0xff] }
   0x8   :  { %91 = vmatprep.subr.mxu0 %v46_v6  ;;  %v31_v21 = vld [vmem:[%s390_s1 + $0x50] sm:$0xff]  ;;  %v30_v22 = vld [vmem:[%s390_s1 + $0x48] sm:$0xff]  ;;  %v29_v23 = vld [vmem:[%s390_s1 + $0x40] sm:$0xff] }
   0x9   :  { %92 = vmatpush1.msra.mxu0 %v45_v7  ;;  %v20_v24 = vld [vmem:[%s391_s0 + $0x8] sm:$0xff]  ;;  %v28_v25 = vld [vmem:[%s390_s1 + $0x38] sm:$0xff]  ;;  %v27_v26 = vld [vmem:[%s390_s1 + $0x30] sm:$0xff] }
   0xa   :  { %93 = vmatprep.subr.mxu0 %v44_v8  ;;  %149 = vmatprep.mubr.f32.mxu0 %v20_v24  ;;  %v26_v27 = vld [vmem:[%s390_s1 + $0x28] sm:$0xff]  ;;  %v25_v28 = vld [vmem:[%s390_s1 + $0x20] sm:$0xff]  ;;  %v24_v29 = vld [vmem:[%s390_s1 + $0x18] sm:$0xff] }
   0xb   :  { %94 = vmatpush1.msra.mxu0 %v43_v9  ;;  %v23_v30 = vld [vmem:[%s390_s1 + $0x10] sm:$0xff]  ;;  %v22_v31 = vld [vmem:[%s390_s1 + $0x8] sm:$0xff]  ;;  %v21_v32 = vld [vmem:[%s390_s1] sm:$0xff] }
   0xc   :  { %95 = vmatprep.subr.mxu0 %v42_v10  ;;  %v84_v33 = vld [vmem:[%s390_s1 + $0x1f8] sm:$0xff]  ;;  %v83_v34 = vld [vmem:[%s390_s1 + $0x1f0] sm:$0xff]  ;;  %v82_v35 = vld [vmem:[%s390_s1 + $0x1e8] sm:$0xff] }
   0xd   :  { %96 = vmatpush1.msra.mxu0 %v41_v11  ;;  %v81_v36 = vld [vmem:[%s390_s1 + $0x1e0] sm:$0xff]  ;;  %v80_v37 = vld [vmem:[%s390_s1 + $0x1d8] sm:$0xff]  ;;  %v79_v38 = vld [vmem:[%s390_s1 + $0x1d0] sm:$0xff] }
   0xe   :  { %97 = vmatprep.subr.mxu0 %v40_v12  ;;  %v78_v39 = vld [vmem:[%s390_s1 + $0x1c8] sm:$0xff]  ;;  %v77_v40 = vld [vmem:[%s390_s1 + $0x1c0] sm:$0xff]  ;;  %v76_v41 = vld [vmem:[%s390_s1 + $0x1b8] sm:$0xff] }
   0xf   :  { %98 = vmatpush1.msra.mxu0 %v39_v13  ;;  %v75_v42 = vld [vmem:[%s390_s1 + $0x1b0] sm:$0xff]  ;;  %v74_v43 = vld [vmem:[%s390_s1 + $0x1a8] sm:$0xff]  ;;  %v73_v44 = vld [vmem:[%s390_s1 + $0x1a0] sm:$0xff] }
  0x10   :  { %99 = vmatprep.subr.mxu0 %v38_v14  ;;  %v72_v45 = vld [vmem:[%s390_s1 + $0x198] sm:$0xff]  ;;  %v71_v46 = vld [vmem:[%s390_s1 + $0x190] sm:$0xff]  ;;  %v70_v47 = vld [vmem:[%s390_s1 + $0x188] sm:$0xff] }
  0x11   :  { %100 = vmatpush1.msra.mxu0 %v37_v15  ;;  %v69_v48 = vld [vmem:[%s390_s1 + $0x180] sm:$0xff]  ;;  %v68_v49 = vld [vmem:[%s390_s1 + $0x178] sm:$0xff]  ;;  %v67_v50 = vld [vmem:[%s390_s1 + $0x170] sm:$0xff] }
  0x12   :  { %101 = vmatprep.subr.mxu0 %v36_v16  ;;  %v66_v51 = vld [vmem:[%s390_s1 + $0x168] sm:$0xff]  ;;  %v65_v52 = vld [vmem:[%s390_s1 + $0x160] sm:$0xff]  ;;  %v64_v53 = vld [vmem:[%s390_s1 + $0x158] sm:$0xff] }
  0x13   :  { %102 = vmatpush1.msra.mxu0 %v35_v17  ;;  %v63_v54 = vld [vmem:[%s390_s1 + $0x150] sm:$0xff]  ;;  %v62_v55 = vld [vmem:[%s390_s1 + $0x148] sm:$0xff]  ;;  %v61_v56 = vld [vmem:[%s390_s1 + $0x140] sm:$0xff] }
  0x14   :  { %103 = vmatprep.subr.mxu0 %v34_v18  ;;  %v60_v57 = vld [vmem:[%s390_s1 + $0x138] sm:$0xff]  ;;  %v59_v58 = vld [vmem:[%s390_s1 + $0x130] sm:$0xff]  ;;  %v58_v59 = vld [vmem:[%s390_s1 + $0x128] sm:$0xff] }
  0x15   :  { %104 = vmatpush1.msra.mxu0 %v33_v19  ;;  %v57_v60 = vld [vmem:[%s390_s1 + $0x120] sm:$0xff]  ;;  %v56_v61 = vld [vmem:[%s390_s1 + $0x118] sm:$0xff]  ;;  %v55_v62 = vld [vmem:[%s390_s1 + $0x110] sm:$0xff] }
  0x16   :  { %105 = vmatprep.subr.mxu0 %v32_v20  ;;  %v54_v63 = vld [vmem:[%s390_s1 + $0x108] sm:$0xff]  ;;  %v53_v0 = vld [vmem:[%s390_s1 + $0x100] sm:$0xff] }
  0x17   :  { %106 = vmatpush1.msra.mxu0 %v31_v21  ;;  %v19_v1 = vld [vmem:[%s391_s0] sm:$0xff] }
  0x18   :  { %107 = vmatprep.subr.mxu0 %v30_v22 }
  0x19   :  { %108 = vmatpush1.msra.mxu0 %v29_v23 }
  0x1a   :  { %109 = vmatprep.subr.mxu0 %v28_v25 }
  0x1b   :  { %110 = vmatpush1.msra.mxu0 %v27_v26 }
  0x1c   :  { %111 = vmatprep.subr.mxu0 %v26_v27 }
  0x1d   :  { %112 = vmatpush1.msra.mxu0 %v25_v28 }
  0x1e   :  { %113 = vmatprep.subr.mxu0 %v24_v29 }
  0x1f   :  { %114 = vmatpush1.msra.mxu0 %v23_v30 }
  0x20   :  { %115 = vmatprep.subr.mxu0 %v22_v31 }
  0x21   :  { %116 = vmatpush1.msra.mxu0 %v21_v32 }
  0x22   :  { %117 = vmatprep.subr.mxu0 %v84_v33 }
  0x23   :  { %118 = vmatpush2.msra.mxu0 %v83_v34 }
  0x24   :  { %119 = vmatprep.subr.mxu0 %v82_v35 }
  0x25   :  { %120 = vmatpush2.msra.mxu0 %v81_v36 }
  0x26   :  { %121 = vmatprep.subr.mxu0 %v80_v37 }
  0x27   :  { %122 = vmatpush2.msra.mxu0 %v79_v38 }
  0x28   :  { %123 = vmatprep.subr.mxu0 %v78_v39 }
  0x29   :  { %124 = vmatpush2.msra.mxu0 %v77_v40 }
  0x2a   :  { %125 = vmatprep.subr.mxu0 %v76_v41 }
  0x2b   :  { %126 = vmatpush2.msra.mxu0 %v75_v42 }
  0x2c   :  { %127 = vmatprep.subr.mxu0 %v74_v43 }
  0x2d   :  { %128 = vmatpush2.msra.mxu0 %v73_v44 }
  0x2e   :  { %129 = vmatprep.subr.mxu0 %v72_v45 }
  0x2f   :  { %130 = vmatpush2.msra.mxu0 %v71_v46 }
  0x30   :  { %131 = vmatprep.subr.mxu0 %v70_v47 }
  0x31   :  { %132 = vmatpush2.msra.mxu0 %v69_v48 }
  0x32   :  { %133 = vmatprep.subr.mxu0 %v68_v49 }
  0x33   :  { %134 = vmatpush2.msra.mxu0 %v67_v50 }
  0x34   :  { %135 = vmatprep.subr.mxu0 %v66_v51 }
  0x35   :  { %136 = vmatpush2.msra.mxu0 %v65_v52 }
  0x36   :  { %137 = vmatprep.subr.mxu0 %v64_v53 }
  0x37   :  { %138 = vmatpush2.msra.mxu0 %v63_v54 }
  0x38   :  { %139 = vmatprep.subr.mxu0 %v62_v55 }
  0x39   :  { %140 = vmatpush2.msra.mxu0 %v61_v56 }
  0x3a   :  { %141 = vmatprep.subr.mxu0 %v60_v57 }
  0x3b   :  { %142 = vmatpush2.msra.mxu0 %v59_v58 }
  0x3c   :  { %143 = vmatprep.subr.mxu0 %v58_v59 }
  0x3d   :  { %144 = vmatpush2.msra.mxu0 %v57_v60 }
  0x3e   :  { %145 = vmatprep.subr.mxu0 %v56_v61 }
  0x3f   :  { %146 = vmatpush2.msra.mxu0 %v55_v62 }
  0x40   :  { %147 = vmatprep.subr.mxu0 %v54_v63 }
  0x41   :  { %148 = vmatpush2.msra.mxu0 %v53_v0 }
  0x42   :  { %150 = vmatmul.mubr.f32.vlgmr.msra.gmra.mxu0 %v19_v1 }
 0x102   :  { %v151_v2 = vpop.f32.mrf.mxu0 }
 0x103   :  { %165 = vst [vmem:[%s392_s2] sm:$0xff] %v151_v2 }
 0x104   :  { %v153_v3 = vpop.f32.mrf.mxu0 }
 0x105   :  { %166 = vst [vmem:[%s392_s2 + $0x8] sm:$0xff] %v153_v3 }

</bundles_post_ra>
